<compile_context>
chip_gen: v6e
topology: v6e:2x2x1
jax: 0.10.0
libtpu: 0.0.40
codegen_flags: <defaults>
</compile_context>

<pallas_src>
import functools

import jax
import jax.numpy as jnp
from jax.experimental import pallas as pl
from jax.experimental.pallas import tpu as pltpu

EPS = 1e-5  # torch.nn.LayerNorm default eps


# ---------------------------------------------------------------------------
# Kernel
# ---------------------------------------------------------------------------
def cam_kernel(x_ref, w_enc_ref, ptok_ref, w_dec_ref, pdec_ref, out_ref):
    """Fused CAM forward for a chunk of Bt batch elements.

    x_ref / out_ref : (Bt, T, D_model) blocks, in the caller's activation dtype.
    w_enc_ref       : (D_model, d_token)   MXU dtype (bf16 by default)
    ptok_ref        : (5, d_token) f32 rows = [b_enc, ln_g, ln_b,
                                               alpha/(1+alpha), 1/(1+alpha)]
    w_dec_ref       : (d_token, D_model)   MXU dtype
    pdec_ref        : (3, D_model) f32 rows = [b_dec, ln_g, ln_b]
    """
    Bt, T, D = x_ref.shape
    d_token = w_enc_ref.shape[1]
    n = Bt * T
    mxu_dtype = w_enc_ref.dtype

    # 1) relative to the first timestep (input dtype — no blanket f32 upcast),
    #    then flatten (batch, time) so each vmatmul sees n rows.
    x = x_ref[...]
    rel = (x - x[:, 0:1, :]).reshape(n, D)

    # 2) proj_enc (bf16 MXU operands, f32 accumulate) + LayerNorm(d_token)
    #    with fused single-pass statistics.
    s = jnp.dot(rel.astype(mxu_dtype), w_enc_ref[...],
                preferred_element_type=jnp.float32)
    s = s + ptok_ref[0:1, :]                               # b_enc
    mu = jnp.mean(s, axis=-1, keepdims=True)
    ms = jnp.mean(s * s, axis=-1, keepdims=True)
    var = jnp.maximum(ms - mu * mu, 0.0)
    s = (s - mu) * jax.lax.rsqrt(var + EPS) * ptok_ref[1:2, :] + ptok_ref[2:3, :]

    # 3) temporal mixing: ctx[t] = s[t]/(1+a) + s[t+1]*a/(1+a) for t < T-1,
    #    ctx[T-1] = s[T-1].  s_next via an XLU sublane rotate; rows with
    #    (i mod T) == T-1 keep s exactly (matches the reference branch and
    #    neutralises the roll's wrap across batch boundaries).
    s_next = pltpu.roll(s, shift=n - 1, axis=0)            # s_next[i] = s[(i+1) % n]
    row = jax.lax.broadcasted_iota(jnp.int32, (n, d_token), 0)
    if (T & (T - 1)) == 0:                                 # power of two: cheap mask
        t_idx = row & (T - 1)
    else:
        t_idx = row % T
    is_last_t = t_idx == (T - 1)
    mixed = s * ptok_ref[4:5, :] + s_next * ptok_ref[3:4, :]
    ctx = jnp.where(is_last_t, s, mixed)

    # 4) proj_dec (bf16 MXU operands) + LayerNorm(d_model), fused stats.
    y = jnp.dot(ctx.astype(mxu_dtype), w_dec_ref[...],
                preferred_element_type=jnp.float32)
    y = y + pdec_ref[0:1, :]
    mu2 = jnp.mean(y, axis=-1, keepdims=True)
    ms2 = jnp.mean(y * y, axis=-1, keepdims=True)
    var2 = jnp.maximum(ms2 - mu2 * mu2, 0.0)
    y = (y - mu2) * jax.lax.rsqrt(var2 + EPS) * pdec_ref[1:2, :] + pdec_ref[2:3, :]

    out_ref[...] = y.reshape(Bt, T, D).astype(out_ref.dtype)


# ---------------------------------------------------------------------------
# Wrapper / tiling
# ---------------------------------------------------------------------------
_VMEM_BLOCK_BUDGET = 24 * 1024 * 1024   # pipelined blocks + intermediates budget
_VMEM_LIMIT_BYTES = 48 * 1024 * 1024    # < v7x 64 MiB physical, > 32 MiB default


def _pick_batch_tile(B, T, D, d_token, x_bytes, out_bytes,
                     budget_bytes=_VMEM_BLOCK_BUDGET):
    """Batch tile: target >= 512 MXU rows per grid step, keep >= 2 grid steps
    when B >= 2 (megacore balance), and keep double-buffered I/O blocks plus
    f32 intermediates under an explicit VMEM budget (binding on v7x)."""
    bt_cap = max(1, -(-512 // T))            # ceil(512 / T) rows target
    if B >= 2:
        bt_cap = min(bt_cap, max(1, B // 2))
    bt_cap = min(bt_cap, B)
    for bt in range(bt_cap, 0, -1):
        if B % bt:
            continue
        n = bt * T
        io = 2 * n * D * (x_bytes + out_bytes)             # double-buffered in/out
        interm = 3 * n * D * 4 + 4 * n * d_token * 4       # rough f32 intermediates
        if io + interm <= budget_bytes:
            return bt
    return 1


@functools.partial(jax.jit, static_argnames=("batch_tile", "single_buffer_params"))
def _cam_forward_jit(x, w_enc, ptok, w_dec, pdec, *, batch_tile,
                     single_buffer_params):
    B, T, D = x.shape
    d_token = w_enc.shape[1]
    Bt = batch_tile

    def const_spec(shape):
        idx = lambda b, _nd=len(shape): (0,) * _nd
        if single_buffer_params:
            # Constant index_map -> one buffer is enough; second is VMEM waste.
            return pl.BlockSpec(shape, idx, pipeline_mode=pl.Buffered(1))
        return pl.BlockSpec(shape, idx)

    return pl.pallas_call(
        cam_kernel,
        out_shape=jax.ShapeDtypeStruct((B, T, D), x.dtype),
        grid=(B // Bt,),
        in_specs=[
            pl.BlockSpec((Bt, T, D), lambda b: (b, 0, 0)),  # x_enc chunk
            const_spec((D, d_token)),                       # w_enc (MXU dtype)
            const_spec((5, d_token)),                       # packed enc params (f32)
            const_spec((d_token, D)),                       # w_dec (MXU dtype)
            const_spec((3, D)),                             # packed dec params (f32)
        ],
        out_specs=pl.BlockSpec((Bt, T, D), lambda b: (b, 0, 0)),
        compiler_params=pltpu.CompilerParams(
            dimension_semantics=("parallel",),
            vmem_limit_bytes=_VMEM_LIMIT_BYTES),
    )(x, w_enc, ptok, w_dec, pdec)


def pack_cam_params(p, mxu_dtype=jnp.bfloat16):
    """One-time parameter packing (hoisted out of the per-call forward).

    Returns (w_enc, ptok, w_dec, pdec):
      w_enc : (d_model, d_token) in mxu_dtype (bf16 MXU operand)
      ptok  : (5, d_token) f32 rows = [b_enc, ln_g, ln_b, a/(1+a), 1/(1+a)]
      w_dec : (d_token, d_model) in mxu_dtype
      pdec  : (3, d_model) f32 rows = [b_dec, ln_g, ln_b]
    """
    f32 = jnp.float32
    d_model, d_token = p["w_enc"].shape

    def row(v, nfeat):
        return jnp.asarray(v, f32).reshape(1, nfeat)

    alpha = row(p["alpha"], d_token)
    ptok = jnp.concatenate(
        [row(p["b_enc"], d_token), row(p["g_enc"], d_token),
         row(p["be_enc"], d_token), alpha / (1.0 + alpha), 1.0 / (1.0 + alpha)],
        axis=0)                                             # (5, d_token)
    pdec = jnp.concatenate(
        [row(p["b_dec"], d_model), row(p["g_dec"], d_model),
         row(p["be_dec"], d_model)], axis=0)                # (3, d_model)
    return (jnp.asarray(p["w_enc"], mxu_dtype), ptok,
            jnp.asarray(p["w_dec"], mxu_dtype), pdec)


def cam_forward(x, packed_params, *, batch_tile=None):
    """CAM forward.  `packed_params` comes from pack_cam_params (called once)."""
    w_enc, ptok, w_dec, pdec = packed_params
    B, T, D = x.shape
    d_token = w_enc.shape[1]
    if batch_tile is None:
        nbytes = x.dtype.itemsize
        batch_tile = _pick_batch_tile(B, T, D, d_token, nbytes, nbytes)
    assert B % batch_tile == 0, f"batch {B} must be divisible by tile {batch_tile}"
    # NOTE: the (Bt,T,D)->(Bt*T,D) merge is layout-free only when T % 8 == 0
    # (f32) / T % 16 == 0 (bf16); otherwise correct but a relayout copy occurs.
    try:
        return _cam_forward_jit(x, w_enc, ptok, w_dec, pdec,
                                batch_tile=batch_tile, single_buffer_params=True)
    except Exception:
        # Fallback if pl.Buffered(1) is rejected by this jax/Mosaic version:
        # identical kernel, default double-buffered constant inputs.
        return _cam_forward_jit(x, w_enc, ptok, w_dec, pdec,
                                batch_tile=batch_tile, single_buffer_params=False)


# ---------------------------------------------------------------------------
# Init + pure-JAX reference (for correctness check)
# ---------------------------------------------------------------------------
def init_params(key, d_model, d_token, alpha_val=0.9):
    """Deterministic synthetic init mirroring the module's _init_weights."""
    k_enc, k_dec = jax.random.split(key)

    def xavier_uniform(k, fan_in, fan_out):
        limit = (6.0 / (fan_in + fan_out)) ** 0.5
        # stored as (in, out) so the kernel computes x @ W (== x @ W_torch.T)
        return jax.random.uniform(k, (fan_in, fan_out), jnp.float32,
                                  -limit, limit)

    return dict(
        w_enc=xavier_uniform(k_enc, d_model, d_token),
        b_enc=jnp.zeros((1, d_token), jnp.float32),
        g_enc=jnp.ones((1, d_token), jnp.float32),
        be_enc=jnp.zeros((1, d_token), jnp.float32),
        alpha=jnp.full((1, d_token), alpha_val, jnp.float32),
        w_dec=xavier_uniform(k_dec, d_token, d_model),
        b_dec=jnp.zeros((1, d_model), jnp.float32),
        g_dec=jnp.ones((1, d_model), jnp.float32),
        be_dec=jnp.zeros((1, d_model), jnp.float32),
    )


def cam_reference(x, p):
    """Pure-JAX f32 reference of the PyTorch forward."""
    rel = x - x[:, 0:1]
    s = rel @ p["w_enc"] + p["b_enc"]
    mu = s.mean(-1, keepdims=True)
    var = ((s - mu) ** 2).mean(-1, keepdims=True)
    s = (s - mu) / jnp.sqrt(var + EPS) * p["g_enc"] + p["be_enc"]
    T = x.shape[1]
    toks = []
    for t in range(T):
        if t == T - 1:
            toks.append(s[:, t])
        else:
            toks.append((s[:, t] + p["alpha"] * s[:, t + 1]) / (1 + p["alpha"]))
    ctx = jnp.stack(toks, axis=1)
    y = ctx @ p["w_dec"] + p["b_dec"]
    mu2 = y.mean(-1, keepdims=True)
    var2 = ((y - mu2) ** 2).mean(-1, keepdims=True)
    return (y - mu2) / jnp.sqrt(var2 + EPS) * p["g_dec"] + p["be_dec"]


if __name__ == "__main__":
    # Small shapes consistent with the module: seqlen=T=8, d_model=32
    # (32 % 8 == 0), d_token=16, batch=2.
    B, T, D_MODEL, D_TOKEN = 2, 8, 32, 16

    key = jax.random.PRNGKey(0)
    k_x, k_p = jax.random.split(key)
    x = jax.random.normal(k_x, (B, T, D_MODEL), jnp.float32)
    params = init_params(k_p, D_MODEL, D_TOKEN, alpha_val=0.9)
    packed = pack_cam_params(params)          # one-time prep, hoisted out of forward

    out = cam_forward(x, packed)
    out = jax.block_until_ready(out)

    ref = cam_reference(x, params)
    assert out.shape == (B, T, D_MODEL)
    assert out.dtype == x.dtype
    # bf16 MXU operands + fused E[x^2]-mu^2 variance -> small, bounded drift
    # vs. the f32 reference.
    err = float(jnp.max(jnp.abs(out.astype(jnp.float32) - ref)))
    assert err < 5e-2, f"mismatch vs reference: max abs err {err}"

    print("KERNEL_OK")
</pallas_src>

<mosaic_0001>
module attributes {stable_mosaic.version = 11 : i64} {
  func.func @cam_kernel(%arg0: i32, %arg1: memref<1x8x32xf32, #tpu.memory_space<vmem>>, %arg2: memref<32x16xbf16, #tpu.memory_space<vmem>>, %arg3: memref<5x16xf32, #tpu.memory_space<vmem>>, %arg4: memref<16x32xbf16, #tpu.memory_space<vmem>>, %arg5: memref<3x32xf32, #tpu.memory_space<vmem>>, %arg6: memref<1x8x32xf32, #tpu.memory_space<vmem>>) attributes {dimension_semantics = [#tpu.dimension_semantics<parallel>], iteration_bounds = array<i64: 2>, scalar_prefetch = 0 : i64, scratch_operands = 0 : i64, tpu.core_type = #tpu.core_type<tc>, window_params = [{transform_indices = @transform_0, window_bounds = array<i64: 1, 8, 32>}, {pipeline_mode = #tpu.pipeline_mode<synchronous>, transform_indices = @transform_1, window_bounds = array<i64: 32, 16>}, {pipeline_mode = #tpu.pipeline_mode<synchronous>, transform_indices = @transform_2, window_bounds = array<i64: 5, 16>}, {pipeline_mode = #tpu.pipeline_mode<synchronous>, transform_indices = @transform_3, window_bounds = array<i64: 16, 32>}, {pipeline_mode = #tpu.pipeline_mode<synchronous>, transform_indices = @transform_4, window_bounds = array<i64: 3, 32>}, {transform_indices = @transform_5, window_bounds = array<i64: 1, 8, 32>}]} {
    %c0 = arith.constant 0 : index
    %c0_0 = arith.constant 0 : index
    %c0_1 = arith.constant 0 : index
    %0 = vector.load %arg1[%c0, %c0_0, %c0_1] : memref<1x8x32xf32, #tpu.memory_space<vmem>>, vector<1x8x32xf32>
    %1 = vector.extract_strided_slice %0 {offsets = [0, 0, 0], sizes = [1, 1, 32], strides = [1, 1, 1]} : vector<1x8x32xf32> to vector<1x1x32xf32>
    %2 = vector.broadcast %1 : vector<1x1x32xf32> to vector<1x8x32xf32>
    %3 = arith.subf %0, %2 : vector<1x8x32xf32>
    %4 = vector.shape_cast %3 : vector<1x8x32xf32> to vector<8x32xf32>
    %5 = arith.truncf %4 : vector<8x32xf32> to vector<8x32xbf16>
    %c0_2 = arith.constant 0 : index
    %c0_3 = arith.constant 0 : index
    %6 = vector.load %arg2[%c0_2, %c0_3] : memref<32x16xbf16, #tpu.memory_space<vmem>>, vector<32x16xbf16>
    %cst = arith.constant dense<0.000000e+00> : vector<8x16xf32>
    %7 = tpu.matmul %5, %6, %cst {dimension_numbers = #tpu.dot_dimension_numbers<[1], [0], [0], [1], [0, 0, 1, 1], [], []>} : vector<8x32xbf16>, vector<32x16xbf16>, vector<8x16xf32> -> vector<8x16xf32>
    %c0_4 = arith.constant 0 : index
    %c0_5 = arith.constant 0 : index
    %8 = vector.load %arg3[%c0_4, %c0_5] : memref<5x16xf32, #tpu.memory_space<vmem>>, vector<1x16xf32>
    %9 = vector.broadcast %8 : vector<1x16xf32> to vector<8x16xf32>
    %10 = arith.addf %7, %9 : vector<8x16xf32>
    %cst_6 = arith.constant dense<0.000000e+00> : vector<8xf32>
    %11 = vector.multi_reduction <add>, %10, %cst_6 [1] : vector<8x16xf32> to vector<8xf32>
    %12 = vector.shape_cast %11 : vector<8xf32> to vector<8x1xf32>
    %cst_7 = arith.constant 1.600000e+01 : f32
    %13 = vector.broadcast %cst_7 : f32 to vector<8x1xf32>
    %14 = arith.divf %12, %13 : vector<8x1xf32>
    %15 = arith.mulf %10, %10 : vector<8x16xf32>
    %cst_8 = arith.constant dense<0.000000e+00> : vector<8xf32>
    %16 = vector.multi_reduction <add>, %15, %cst_8 [1] : vector<8x16xf32> to vector<8xf32>
    %17 = vector.shape_cast %16 : vector<8xf32> to vector<8x1xf32>
    %cst_9 = arith.constant 1.600000e+01 : f32
    %18 = vector.broadcast %cst_9 : f32 to vector<8x1xf32>
    %19 = arith.divf %17, %18 : vector<8x1xf32>
    %20 = arith.mulf %14, %14 : vector<8x1xf32>
    %21 = arith.subf %19, %20 : vector<8x1xf32>
    %cst_10 = arith.constant 0.000000e+00 : f32
    %22 = vector.broadcast %cst_10 : f32 to vector<8x1xf32>
    %23 = arith.maximumf %21, %22 : vector<8x1xf32>
    %24 = vector.broadcast %14 : vector<8x1xf32> to vector<8x16xf32>
    %25 = arith.subf %10, %24 : vector<8x16xf32>
    %cst_11 = arith.constant 9.99999974E-6 : f32
    %26 = vector.broadcast %cst_11 : f32 to vector<8x1xf32>
    %27 = arith.addf %23, %26 : vector<8x1xf32>
    %28 = math.rsqrt %27 : vector<8x1xf32>
    %29 = vector.broadcast %28 : vector<8x1xf32> to vector<8x16xf32>
    %30 = arith.mulf %25, %29 : vector<8x16xf32>
    %c1 = arith.constant 1 : index
    %c0_12 = arith.constant 0 : index
    %31 = vector.load %arg3[%c1, %c0_12] : memref<5x16xf32, #tpu.memory_space<vmem>>, vector<1x16xf32>
    %32 = vector.broadcast %31 : vector<1x16xf32> to vector<8x16xf32>
    %33 = arith.mulf %30, %32 : vector<8x16xf32>
    %c2 = arith.constant 2 : index
    %c0_13 = arith.constant 0 : index
    %34 = vector.load %arg3[%c2, %c0_13] : memref<5x16xf32, #tpu.memory_space<vmem>>, vector<1x16xf32>
    %35 = vector.broadcast %34 : vector<1x16xf32> to vector<8x16xf32>
    %36 = arith.addf %33, %35 : vector<8x16xf32>
    %c7_i32 = arith.constant 7 : i32
    %37 = tpu.dynamic_rotate %36 by %c7_i32 dim 0 : vector<8x16xf32>, i32 -> vector<8x16xf32>
    %38 = tpu.iota {dimensions = array<i32: 0>} : vector<8x16xi32>
    %c7_i32_14 = arith.constant 7 : i32
    %39 = vector.broadcast %c7_i32_14 : i32 to vector<8x16xi32>
    %40 = arith.andi %38, %39 : vector<8x16xi32>
    %c7_i32_15 = arith.constant 7 : i32
    %41 = vector.broadcast %c7_i32_15 : i32 to vector<8x16xi32>
    %42 = arith.cmpi eq, %40, %41 : vector<8x16xi32>
    %c4 = arith.constant 4 : index
    %c0_16 = arith.constant 0 : index
    %43 = vector.load %arg3[%c4, %c0_16] : memref<5x16xf32, #tpu.memory_space<vmem>>, vector<1x16xf32>
    %44 = vector.broadcast %43 : vector<1x16xf32> to vector<8x16xf32>
    %45 = arith.mulf %36, %44 : vector<8x16xf32>
    %c3 = arith.constant 3 : index
    %c0_17 = arith.constant 0 : index
    %46 = vector.load %arg3[%c3, %c0_17] : memref<5x16xf32, #tpu.memory_space<vmem>>, vector<1x16xf32>
    %47 = vector.broadcast %46 : vector<1x16xf32> to vector<8x16xf32>
    %48 = arith.mulf %37, %47 : vector<8x16xf32>
    %49 = arith.addf %45, %48 : vector<8x16xf32>
    %50 = arith.select %42, %36, %49 : vector<8x16xi1>, vector<8x16xf32>
    %51 = arith.truncf %50 : vector<8x16xf32> to vector<8x16xbf16>
    %c0_18 = arith.constant 0 : index
    %c0_19 = arith.constant 0 : index
    %52 = vector.load %arg4[%c0_18, %c0_19] : memref<16x32xbf16, #tpu.memory_space<vmem>>, vector<16x32xbf16>
    %cst_20 = arith.constant dense<0.000000e+00> : vector<8x32xf32>
    %53 = tpu.matmul %51, %52, %cst_20 {dimension_numbers = #tpu.dot_dimension_numbers<[1], [0], [0], [1], [0, 0, 1, 1], [], []>} : vector<8x16xbf16>, vector<16x32xbf16>, vector<8x32xf32> -> vector<8x32xf32>
    %c0_21 = arith.constant 0 : index
    %c0_22 = arith.constant 0 : index
    %54 = vector.load %arg5[%c0_21, %c0_22] : memref<3x32xf32, #tpu.memory_space<vmem>>, vector<1x32xf32>
    %55 = vector.broadcast %54 : vector<1x32xf32> to vector<8x32xf32>
    %56 = arith.addf %53, %55 : vector<8x32xf32>
    %cst_23 = arith.constant dense<0.000000e+00> : vector<8xf32>
    %57 = vector.multi_reduction <add>, %56, %cst_23 [1] : vector<8x32xf32> to vector<8xf32>
    %58 = vector.shape_cast %57 : vector<8xf32> to vector<8x1xf32>
    %cst_24 = arith.constant 3.200000e+01 : f32
    %59 = vector.broadcast %cst_24 : f32 to vector<8x1xf32>
    %60 = arith.divf %58, %59 : vector<8x1xf32>
    %61 = arith.mulf %56, %56 : vector<8x32xf32>
    %cst_25 = arith.constant dense<0.000000e+00> : vector<8xf32>
    %62 = vector.multi_reduction <add>, %61, %cst_25 [1] : vector<8x32xf32> to vector<8xf32>
    %63 = vector.shape_cast %62 : vector<8xf32> to vector<8x1xf32>
    %cst_26 = arith.constant 3.200000e+01 : f32
    %64 = vector.broadcast %cst_26 : f32 to vector<8x1xf32>
    %65 = arith.divf %63, %64 : vector<8x1xf32>
    %66 = arith.mulf %60, %60 : vector<8x1xf32>
    %67 = arith.subf %65, %66 : vector<8x1xf32>
    %cst_27 = arith.constant 0.000000e+00 : f32
    %68 = vector.broadcast %cst_27 : f32 to vector<8x1xf32>
    %69 = arith.maximumf %67, %68 : vector<8x1xf32>
    %70 = vector.broadcast %60 : vector<8x1xf32> to vector<8x32xf32>
    %71 = arith.subf %56, %70 : vector<8x32xf32>
    %cst_28 = arith.constant 9.99999974E-6 : f32
    %72 = vector.broadcast %cst_28 : f32 to vector<8x1xf32>
    %73 = arith.addf %69, %72 : vector<8x1xf32>
    %74 = math.rsqrt %73 : vector<8x1xf32>
    %75 = vector.broadcast %74 : vector<8x1xf32> to vector<8x32xf32>
    %76 = arith.mulf %71, %75 : vector<8x32xf32>
    %c1_29 = arith.constant 1 : index
    %c0_30 = arith.constant 0 : index
    %77 = vector.load %arg5[%c1_29, %c0_30] : memref<3x32xf32, #tpu.memory_space<vmem>>, vector<1x32xf32>
    %78 = vector.broadcast %77 : vector<1x32xf32> to vector<8x32xf32>
    %79 = arith.mulf %76, %78 : vector<8x32xf32>
    %c2_31 = arith.constant 2 : index
    %c0_32 = arith.constant 0 : index
    %80 = vector.load %arg5[%c2_31, %c0_32] : memref<3x32xf32, #tpu.memory_space<vmem>>, vector<1x32xf32>
    %81 = vector.broadcast %80 : vector<1x32xf32> to vector<8x32xf32>
    %82 = arith.addf %79, %81 : vector<8x32xf32>
    %83 = vector.shape_cast %82 : vector<8x32xf32> to vector<1x8x32xf32>
    %c0_33 = arith.constant 0 : index
    %c0_34 = arith.constant 0 : index
    %c0_35 = arith.constant 0 : index
    %84 = vector.load %arg6[%c0_33, %c0_34, %c0_35] : memref<1x8x32xf32, #tpu.memory_space<vmem>>, vector<1x8x32xf32>
    tpu.vector_store %arg6[%c0_33, %c0_34, %c0_35], %83 {strides = array<i32>} : memref<1x8x32xf32, #tpu.memory_space<vmem>>, vector<1x8x32xf32>,
    return
  }
  func.func @transform_0(%arg0: i32) -> (i32, i32, i32) {
    %c0_i32 = arith.constant 0 : i32
    %c0_i32_0 = arith.constant 0 : i32
    %c0_i32_1 = arith.constant 0 : i32
    return %arg0, %c0_i32, %c0_i32_0 : i32, i32, i32
  }
  func.func @transform_1(%arg0: i32) -> (i32, i32) {
    %c0_i32 = arith.constant 0 : i32
    %c0_i32_0 = arith.constant 0 : i32
    %c0_i32_1 = arith.constant 0 : i32
    return %c0_i32, %c0_i32_0 : i32, i32
  }
  func.func @transform_2(%arg0: i32) -> (i32, i32) {
    %c0_i32 = arith.constant 0 : i32
    %c0_i32_0 = arith.constant 0 : i32
    %c0_i32_1 = arith.constant 0 : i32
    return %c0_i32, %c0_i32_0 : i32, i32
  }
  func.func @transform_3(%arg0: i32) -> (i32, i32) {
    %c0_i32 = arith.constant 0 : i32
    %c0_i32_0 = arith.constant 0 : i32
    %c0_i32_1 = arith.constant 0 : i32
    return %c0_i32, %c0_i32_0 : i32, i32
  }
  func.func @transform_4(%arg0: i32) -> (i32, i32) {
    %c0_i32 = arith.constant 0 : i32
    %c0_i32_0 = arith.constant 0 : i32
    %c0_i32_1 = arith.constant 0 : i32
    return %c0_i32, %c0_i32_0 : i32, i32
  }
  func.func @transform_5(%arg0: i32) -> (i32, i32, i32) {
    %c0_i32 = arith.constant 0 : i32
    %c0_i32_0 = arith.constant 0 : i32
    %c0_i32_1 = arith.constant 0 : i32
    return %arg0, %c0_i32, %c0_i32_0 : i32, i32, i32
  }
}

module attributes {stable_mosaic.version = 11 : i64} {
  func.func @cam_kernel(%arg0: i32, %arg1: memref<1x8x32xf32, #tpu.memory_space<vmem>>, %arg2: memref<32x16xbf16, #tpu.memory_space<vmem>>, %arg3: memref<5x16xf32, #tpu.memory_space<vmem>>, %arg4: memref<16x32xbf16, #tpu.memory_space<vmem>>, %arg5: memref<3x32xf32, #tpu.memory_space<vmem>>, %arg6: memref<1x8x32xf32, #tpu.memory_space<vmem>>) attributes {dimension_semantics = [#tpu.dimension_semantics<parallel>], iteration_bounds = array<i64: 2>, scalar_prefetch = 0 : i64, scratch_operands = 0 : i64, tpu.core_type = #tpu.core_type<tc>, window_params = [{transform_indices = @transform_0, window_bounds = array<i64: 1, 8, 32>}, {pipeline_mode = #tpu.pipeline_mode<synchronous>, transform_indices = @transform_1, window_bounds = array<i64: 32, 16>}, {pipeline_mode = #tpu.pipeline_mode<synchronous>, transform_indices = @transform_2, window_bounds = array<i64: 5, 16>}, {pipeline_mode = #tpu.pipeline_mode<synchronous>, transform_indices = @transform_3, window_bounds = array<i64: 16, 32>}, {pipeline_mode = #tpu.pipeline_mode<synchronous>, transform_indices = @transform_4, window_bounds = array<i64: 3, 32>}, {transform_indices = @transform_5, window_bounds = array<i64: 1, 8, 32>}]} {
    %c0 = arith.constant 0 : index
    %c0_0 = arith.constant 0 : index
    %c0_1 = arith.constant 0 : index
    %0 = vector.load %arg1[%c0, %c0_0, %c0_1] : memref<1x8x32xf32, #tpu.memory_space<vmem>>, vector<1x8x32xf32>
    %1 = vector.extract_strided_slice %0 {offsets = [0, 0, 0], sizes = [1, 1, 32], strides = [1, 1, 1]} : vector<1x8x32xf32> to vector<1x1x32xf32>
    %2 = vector.broadcast %1 : vector<1x1x32xf32> to vector<1x8x32xf32>
    %3 = arith.subf %0, %2 : vector<1x8x32xf32>
    %4 = vector.shape_cast %3 : vector<1x8x32xf32> to vector<8x32xf32>
    %5 = arith.truncf %4 : vector<8x32xf32> to vector<8x32xbf16>
    %c0_2 = arith.constant 0 : index
    %c0_3 = arith.constant 0 : index
    %6 = vector.load %arg2[%c0_2, %c0_3] : memref<32x16xbf16, #tpu.memory_space<vmem>>, vector<32x16xbf16>
    %cst = arith.constant dense<0.000000e+00> : vector<8x16xf32>
    %7 = tpu.matmul %5, %6, %cst {dimension_numbers = #tpu.dot_dimension_numbers<[1], [0], [0], [1], [0, 0, 1, 1], [], []>} : vector<8x32xbf16>, vector<32x16xbf16>, vector<8x16xf32> -> vector<8x16xf32>
    %c0_4 = arith.constant 0 : index
    %c0_5 = arith.constant 0 : index
    %8 = vector.load %arg3[%c0_4, %c0_5] : memref<5x16xf32, #tpu.memory_space<vmem>>, vector<1x16xf32>
    %9 = vector.broadcast %8 : vector<1x16xf32> to vector<8x16xf32>
    %10 = arith.addf %7, %9 : vector<8x16xf32>
    %cst_6 = arith.constant dense<0.000000e+00> : vector<8xf32>
    %11 = vector.multi_reduction <add>, %10, %cst_6 [1] : vector<8x16xf32> to vector<8xf32>
    %12 = vector.shape_cast %11 : vector<8xf32> to vector<8x1xf32>
    %cst_7 = arith.constant 1.600000e+01 : f32
    %13 = vector.broadcast %cst_7 : f32 to vector<8x1xf32>
    %14 = arith.divf %12, %13 : vector<8x1xf32>
    %15 = arith.mulf %10, %10 : vector<8x16xf32>
    %cst_8 = arith.constant dense<0.000000e+00> : vector<8xf32>
    %16 = vector.multi_reduction <add>, %15, %cst_8 [1] : vector<8x16xf32> to vector<8xf32>
    %17 = vector.shape_cast %16 : vector<8xf32> to vector<8x1xf32>
    %cst_9 = arith.constant 1.600000e+01 : f32
    %18 = vector.broadcast %cst_9 : f32 to vector<8x1xf32>
    %19 = arith.divf %17, %18 : vector<8x1xf32>
    %20 = arith.mulf %14, %14 : vector<8x1xf32>
    %21 = arith.subf %19, %20 : vector<8x1xf32>
    %cst_10 = arith.constant 0.000000e+00 : f32
    %22 = vector.broadcast %cst_10 : f32 to vector<8x1xf32>
    %23 = arith.maximumf %21, %22 : vector<8x1xf32>
    %24 = vector.broadcast %14 : vector<8x1xf32> to vector<8x16xf32>
    %25 = arith.subf %10, %24 : vector<8x16xf32>
    %cst_11 = arith.constant 9.99999974E-6 : f32
    %26 = vector.broadcast %cst_11 : f32 to vector<8x1xf32>
    %27 = arith.addf %23, %26 : vector<8x1xf32>
    %28 = math.rsqrt %27 : vector<8x1xf32>
    %29 = vector.broadcast %28 : vector<8x1xf32> to vector<8x16xf32>
    %30 = arith.mulf %25, %29 : vector<8x16xf32>
    %c1 = arith.constant 1 : index
    %c0_12 = arith.constant 0 : index
    %31 = vector.load %arg3[%c1, %c0_12] : memref<5x16xf32, #tpu.memory_space<vmem>>, vector<1x16xf32>
    %32 = vector.broadcast %31 : vector<1x16xf32> to vector<8x16xf32>
    %33 = arith.mulf %30, %32 : vector<8x16xf32>
    %c2 = arith.constant 2 : index
    %c0_13 = arith.constant 0 : index
    %34 = vector.load %arg3[%c2, %c0_13] : memref<5x16xf32, #tpu.memory_space<vmem>>, vector<1x16xf32>
    %35 = vector.broadcast %34 : vector<1x16xf32> to vector<8x16xf32>
    %36 = arith.addf %33, %35 : vector<8x16xf32>
    %c7_i32 = arith.constant 7 : i32
    %37 = tpu.dynamic_rotate %36 by %c7_i32 dim 0 : vector<8x16xf32>, i32 -> vector<8x16xf32>
    %38 = tpu.iota {dimensions = array<i32: 0>} : vector<8x16xi32>
    %c7_i32_14 = arith.constant 7 : i32
    %39 = vector.broadcast %c7_i32_14 : i32 to vector<8x16xi32>
    %40 = arith.andi %38, %39 : vector<8x16xi32>
    %c7_i32_15 = arith.constant 7 : i32
    %41 = vector.broadcast %c7_i32_15 : i32 to vector<8x16xi32>
    %42 = arith.cmpi eq, %40, %41 : vector<8x16xi32>
    %c4 = arith.constant 4 : index
    %c0_16 = arith.constant 0 : index
    %43 = vector.load %arg3[%c4, %c0_16] : memref<5x16xf32, #tpu.memory_space<vmem>>, vector<1x16xf32>
    %44 = vector.broadcast %43 : vector<1x16xf32> to vector<8x16xf32>
    %45 = arith.mulf %36, %44 : vector<8x16xf32>
    %c3 = arith.constant 3 : index
    %c0_17 = arith.constant 0 : index
    %46 = vector.load %arg3[%c3, %c0_17] : memref<5x16xf32, #tpu.memory_space<vmem>>, vector<1x16xf32>
    %47 = vector.broadcast %46 : vector<1x16xf32> to vector<8x16xf32>
    %48 = arith.mulf %37, %47 : vector<8x16xf32>
    %49 = arith.addf %45, %48 : vector<8x16xf32>
    %50 = arith.select %42, %36, %49 : vector<8x16xi1>, vector<8x16xf32>
    %51 = arith.truncf %50 : vector<8x16xf32> to vector<8x16xbf16>
    %c0_18 = arith.constant 0 : index
    %c0_19 = arith.constant 0 : index
    %52 = vector.load %arg4[%c0_18, %c0_19] : memref<16x32xbf16, #tpu.memory_space<vmem>>, vector<16x32xbf16>
    %cst_20 = arith.constant dense<0.000000e+00> : vector<8x32xf32>
    %53 = tpu.matmul %51, %52, %cst_20 {dimension_numbers = #tpu.dot_dimension_numbers<[1], [0], [0], [1], [0, 0, 1, 1], [], []>} : vector<8x16xbf16>, vector<16x32xbf16>, vector<8x32xf32> -> vector<8x32xf32>
    %c0_21 = arith.constant 0 : index
    %c0_22 = arith.constant 0 : index
    %54 = vector.load %arg5[%c0_21, %c0_22] : memref<3x32xf32, #tpu.memory_space<vmem>>, vector<1x32xf32>
    %55 = vector.broadcast %54 : vector<1x32xf32> to vector<8x32xf32>
    %56 = arith.addf %53, %55 : vector<8x32xf32>
    %cst_23 = arith.constant dense<0.000000e+00> : vector<8xf32>
    %57 = vector.multi_reduction <add>, %56, %cst_23 [1] : vector<8x32xf32> to vector<8xf32>
    %58 = vector.shape_cast %57 : vector<8xf32> to vector<8x1xf32>
    %cst_24 = arith.constant 3.200000e+01 : f32
    %59 = vector.broadcast %cst_24 : f32 to vector<8x1xf32>
    %60 = arith.divf %58, %59 : vector<8x1xf32>
    %61 = arith.mulf %56, %56 : vector<8x32xf32>
    %cst_25 = arith.constant dense<0.000000e+00> : vector<8xf32>
    %62 = vector.multi_reduction <add>, %61, %cst_25 [1] : vector<8x32xf32> to vector<8xf32>
    %63 = vector.shape_cast %62 : vector<8xf32> to vector<8x1xf32>
    %cst_26 = arith.constant 3.200000e+01 : f32
    %64 = vector.broadcast %cst_26 : f32 to vector<8x1xf32>
    %65 = arith.divf %63, %64 : vector<8x1xf32>
    %66 = arith.mulf %60, %60 : vector<8x1xf32>
    %67 = arith.subf %65, %66 : vector<8x1xf32>
    %cst_27 = arith.constant 0.000000e+00 : f32
    %68 = vector.broadcast %cst_27 : f32 to vector<8x1xf32>
    %69 = arith.maximumf %67, %68 : vector<8x1xf32>
    %70 = vector.broadcast %60 : vector<8x1xf32> to vector<8x32xf32>
    %71 = arith.subf %56, %70 : vector<8x32xf32>
    %cst_28 = arith.constant 9.99999974E-6 : f32
    %72 = vector.broadcast %cst_28 : f32 to vector<8x1xf32>
    %73 = arith.addf %69, %72 : vector<8x1xf32>
    %74 = math.rsqrt %73 : vector<8x1xf32>
    %75 = vector.broadcast %74 : vector<8x1xf32> to vector<8x32xf32>
    %76 = arith.mulf %71, %75 : vector<8x32xf32>
    %c1_29 = arith.constant 1 : index
    %c0_30 = arith.constant 0 : index
    %77 = vector.load %arg5[%c1_29, %c0_30] : memref<3x32xf32, #tpu.memory_space<vmem>>, vector<1x32xf32>
    %78 = vector.broadcast %77 : vector<1x32xf32> to vector<8x32xf32>
    %79 = arith.mulf %76, %78 : vector<8x32xf32>
    %c2_31 = arith.constant 2 : index
    %c0_32 = arith.constant 0 : index
    %80 = vector.load %arg5[%c2_31, %c0_32] : memref<3x32xf32, #tpu.memory_space<vmem>>, vector<1x32xf32>
    %81 = vector.broadcast %80 : vector<1x32xf32> to vector<8x32xf32>
    %82 = arith.addf %79, %81 : vector<8x32xf32>
    %83 = vector.shape_cast %82 : vector<8x32xf32> to vector<1x8x32xf32>
    %c0_33 = arith.constant 0 : index
    %c0_34 = arith.constant 0 : index
    %c0_35 = arith.constant 0 : index
    %84 = vector.load %arg6[%c0_33, %c0_34, %c0_35] : memref<1x8x32xf32, #tpu.memory_space<vmem>>, vector<1x8x32xf32>
    tpu.vector_store %arg6[%c0_33, %c0_34, %c0_35], %83 {strides = array<i32>} : memref<1x8x32xf32, #tpu.memory_space<vmem>>, vector<1x8x32xf32>,
    return
  }
  func.func @transform_0(%arg0: i32) -> (i32, i32, i32) {
    %c0_i32 = arith.constant 0 : i32
    %c0_i32_0 = arith.constant 0 : i32
    %c0_i32_1 = arith.constant 0 : i32
    return %arg0, %c0_i32, %c0_i32_0 : i32, i32, i32
  }
  func.func @transform_1(%arg0: i32) -> (i32, i32) {
    %c0_i32 = arith.constant 0 : i32
    %c0_i32_0 = arith.constant 0 : i32
    %c0_i32_1 = arith.constant 0 : i32
    return %c0_i32, %c0_i32_0 : i32, i32
  }
  func.func @transform_2(%arg0: i32) -> (i32, i32) {
    %c0_i32 = arith.constant 0 : i32
    %c0_i32_0 = arith.constant 0 : i32
    %c0_i32_1 = arith.constant 0 : i32
    return %c0_i32, %c0_i32_0 : i32, i32
  }
  func.func @transform_3(%arg0: i32) -> (i32, i32) {
    %c0_i32 = arith.constant 0 : i32
    %c0_i32_0 = arith.constant 0 : i32
    %c0_i32_1 = arith.constant 0 : i32
    return %c0_i32, %c0_i32_0 : i32, i32
  }
  func.func @transform_4(%arg0: i32) -> (i32, i32) {
    %c0_i32 = arith.constant 0 : i32
    %c0_i32_0 = arith.constant 0 : i32
    %c0_i32_1 = arith.constant 0 : i32
    return %c0_i32, %c0_i32_0 : i32, i32
  }
  func.func @transform_5(%arg0: i32) -> (i32, i32, i32) {
    %c0_i32 = arith.constant 0 : i32
    %c0_i32_0 = arith.constant 0 : i32
    %c0_i32_1 = arith.constant 0 : i32
    return %arg0, %c0_i32, %c0_i32_0 : i32, i32, i32
  }
}

</mosaic_0001>

<bundles_post_ra>
// kernel: _cam_forward_jit.1
= control target key start
LH: loop header
LB: loop body
LE: loop exit
PB: predicated region body
PF: predicated region fallthrough
CT: control target
= control target key end

     0   :  { %10 = vsyncpa [#allocation3], 0  ;;  %s904_s0 = inlined_call_operand.vmem [shape: f32[2,8,32], index: 0, kind: input, shape index: {}]   ;;  %s905_s1 = inlined_call_operand.vmem [shape: bf16[32,16], index: 1, kind: input, shape index: {}]   ;;  %s906_s2 = inlined_call_operand.vmem [shape: f32[5,16], index: 2, kind: input, shape index: {}]   ;;  %s907_s3 = inlined_call_operand.hbm [shape: bf16[16,32], index: 3, kind: input, shape index: {}]   ;;  %s908_s4 = inlined_call_operand.vmem [shape: f32[3,32], index: 4, kind: input, shape index: {}]   ;;  %s909_s5 = inlined_call_operand.hbm [shape: f32[2,8,32], index: 5, kind: output, shape index: {}]  }
   0x1   :  { %11 = vsyncpa [#allocation4], 0 }
   0x2   :  { %13 = vsyncpa [#allocation4 + $0x1], 0  ;;  %s762_s18 = smov 0   ;;  %s764_s19 = smov 0  }
   0x3   :  { %s766_s20 = smov 0   ;;  %s768_s21 = smov 0  }
   0x4 LB: > { %s783_s22 = sadd.s32 4294967295, %s724_s21   ;;  %s529_s23 = sadd.s32 4294967294, %s724_s21   ;;  %s724_s21 = sphi %s768_s21, %s917_s21   ;;  %s720_s20 = sphi %s766_s20, %s916_s20   ;;  %s716_s19 = sphi %s764_s19, %s915_s19   ;;  %s712_s18 = sphi %s762_s18, %s914_s18  }
   0x5   : > { %s787_s24 = sadd.s32 1, %s724_s21   ;;  %s136_s25 = sadd.s32 1, %s720_s20 }
   0x6   : > { %s133_s26 = ssub.s32 %s724_s21, %s787_s24  ;;  %p146_p0 = scmp.ne.s32.totalorder %s720_s20, %s716_s19 }
   0x7   : > { %p134_p1 = scmp.eq.s32.totalorder %s133_s26, 0  ;;  %p147_p2 = scmp.eq.s32.totalorder %s783_s22, 1 }
   0x8   : > { %p152_p3 = scmp.ne.s32.totalorder %s716_s19, %s712_s18  ;;  %p153_p4 = scmp.eq.s32.totalorder %s529_s23, 1 }
   0x9   : > { %s798_s27 = scalar_select %p134_p1, %s720_s20, %s136_s25  }
   0xa   : > { %p800_p5 = por %p147_p2, %p146_p0  ;;  %p804_p6 = por %p153_p4, %p152_p3 }
   0xb   : > { %p530_p7 = scmp.ge.s32.totalorder %s724_s21, 1  ;;  %p160_p8 = scmp.lt.s32.totalorder %s724_s21, 3 }
   0xc   : > { %s911_s29 = scalar_select %p804_p6, 1, 0 }
   0xd   : > { %p587_p9 = scmp.eq.s32.totalorder %s783_s22, 0  ;;  %p811_p10 = pnand %p530_p7, %p160_p8 }
   0xe   : > { %s726_s6 = smov [#allocation2]  }
   0xf   : > { %s178_s7 = sshll.u32 %s726_s6, 4  ;;  %p579_p11 = pneg %p811_p10  ;;  %s179_s7 = int_to_ptr.vmem [resolvable:$true] %s178_s7 }
  0x10   : > { %s645_s8 = scalar_lea.vmem %s179_s7, 128  ;;  %p653_p3 = scmp.lt.s32.totalorder %s179_s7, %s179_s7 }
  0x11   : > { %p580_p12 = pnand %p587_p9, %p579_p11  ;;  %p646_p0 = scmp.ne.s32.totalorder %s179_s7, %s645_s8 }
  0x12   : > { %p654_p4 = scmp.lt.s32.totalorder %s645_s8, %s645_s8 }
  0x13   : > { %p636_p13 = pneg %p580_p12 }
  0x14   : > { %p655_p6 = por %p654_p4, %p653_p3 }
  0x15   : > { %p648_p1 = pnand %p646_p0, %p636_p13 }
  0x17   : > { %p649_p2 = pneg %p648_p1 }
  0x19   : > { %p656_p7 = pnand %p655_p6, %p649_p2 }
  0x1b   : > { %659 = shalt.err (!%p656_p7)
}
  0x1c   : > { %s727_s9 = smov 64   ;;  %s728_s10 = smov 4  }
  0x1d   : > { %582 = dma.hbm_to_vmem [thread:$0]  (!%p580_p12), %s907_s3, 128, %s179_s7, [#allocation3], %s727_s9, %s727_s9, %s728_s10  }
  0x1e   : > { %204 = sbr.rel (%p811_p10) target bundleno = 803 (0x323), region = 40 }
  0x23   : > { %703 = dma.done.wait (%p587_p9), [#allocation3], 128  }
  0x24   : > { %705 = vsyncadd (%p587_p9), [#allocation3], 4294967168  ;;  %p231_p8 = scmp.lt.s32.totalorder %s783_s22, 1  ;;  %v237_v0 = vlaneseq  ;;  %v729_v1 = vmov 0.0   ;;  %vm730_vm0 = vmmov 0   ;;  %v627_v4 = vld [vmem:[%s905_s1 + $0x8] sm:$0xff]  }
  0x25   : > { %559 = vmatprep.subr.bf16.mxu0 %v729_v1  ;;  %563 = vmatprep.mubr.msk.bf16.mxu0 %vm730_vm0, %v729_v1  ;;  %v628_v5 = vld [vmem:[%s905_s1] sm:$0xff]   ;;  %vm264_vm1 = vcmask 261120   ;;  %vm308_vm2 = vcmask 130048   ;;  %s228_s23 = sand.u32 1, %s716_s19   ;;  %s551_s8 = sshll.u32 %s783_s22, 7 }
  0x26   : > { %s232_s13 = scalar_select %p231_p8, %s783_s22, 1  ;;  %v238_v2 = vshrl.u32 %v237_v0, 7  ;;  %567 = vmatprep.subr.bf16.mxu1 %v729_v1  ;;  %569 = vmatprep.mubr.msk.bf16.mxu1 %vm730_vm0, %v729_v1  ;;  %v537_v10 = vld [vmem:[%s906_s2] ss:$0 sm:$0xff]  ;;  %v541_v30 = vld [vmem:[%s906_s2 + $0x1] ss:$0 sm:$0xff] }
  0x27   : > { %560 = vmatpush3.bf16.msra.mxu0 %v627_v4  ;;  %v629_v19 = vld [vmem:[#allocation2] sm:$0xff]   ;;  %s535_s25 = sshll.u32 %s228_s23, 3  ;;  %s731_s16 = smov [#allocation5]  }
  0x28   : > { %s536_s14 = sshll.u32 %s232_s13, 3  ;;  %v239_v3 = vsub.s32 0, %v238_v2  ;;  %561 = vmatprep.subr.bf16.mxu0 %v729_v1  ;;  %568 = vmatpush3.bf16.msra.mxu1 %v629_v19  ;;  %v542_v32 = vld [vmem:[%s906_s2 + $0x2] ss:$0 sm:$0xff]  ;;  %v341_v35 = vand.u32 7, %v238_v2  ;;  %s230_s9 = scalar_lea.vmem [#allocation5], %s535_s25 }
  0x29   : > { %s234_s17 = scalar_lea.vmem %s904_s0, %s536_s14  ;;  %v543_v36 = vld [vmem:[%s906_s2 + $0x4] ss:$0 sm:$0xff]  ;;  %v544_v37 = vld [vmem:[%s906_s2 + $0x3] ss:$0 sm:$0xff]  ;;  %v545_v44 = vld [vmem:[%s908_s4] ss:$0 sm:$0xff]  ;;  %s456_s13 = scalar_lea.hbm %s909_s5, %s551_s8 }
  0x2a   : > { %v236_v6 = vld [vmem:[%s234_s17] sm:$0xff]  ;;  %vm342_vm3 = vcmp.eq.s32.totalorder %v341_v35, 7  ;;  %s458_s10 = sshll.u32 %s230_s9, 4  ;;  %s445_s14 = scalar_lea.sflag [#allocation4], %s228_s23  ;;  %s459_s10 = int_to_ptr.vmem [resolvable:$true] %s458_s10 }
  0x2b   : > { %v240_v7 = vrot.slane %v236_v6, %v239_v3  ;;  %562 = vmatpush3.bf16.msra.mxu0 %v628_v5  ;;  %v548_v63 = vld [vmem:[%s908_s4 + $0x1] ss:$0 sm:$0xff]  ;;  %v549_v1 = vld [vmem:[%s908_s4 + $0x2] ss:$0 sm:$0xff]  ;;  %s660_s15 = scalar_lea.vmem %s459_s10, 128  ;;  %s664_s17 = sshll.u32 %s731_s16, 4  ;;  %s665_s17 = int_to_ptr.vmem [resolvable:$false] %s664_s17 }
  0x2c   : > { %p661_p6 = scmp.ne.s32.totalorder %s459_s10, %s660_s15  ;;  %s666_s22 = scalar_lea.vmem %s665_s17, 256 }
  0x2d   : > { %v241_v8 = vsub.f32 %v236_v6, %v240_v7  ;;  %p667_p11 = scmp.lt.s32.totalorder %s459_s10, %s665_s17  ;;  %p668_p12 = scmp.lt.s32.totalorder %s666_s22, %s660_s15 }
  0x2e   : > { %p662_p9 = pnand %p661_p6, %p800_p5 }
  0x2f   : > { %v242_v9 = vpack.c.bf16 %v241_v8, %v241_v8  ;;  %p669_p13 = por %p668_p12, %p667_p11 }
  0x30   : > { %p663_p10 = pneg %p662_p9 }
  0x31   : > { %564 = vmatmul.mubr.msk.bf16.vlgmr.msra.gmra.mxu0 %vm264_vm1, %v242_v9 }
  0x32   : > { %p670_p0 = pnand %p669_p13, %p663_p10 }
  0xf1   : > { %v302_v11 = vpop.f32.mrf.mxu0 }
  0xf2   : > { %v303_v12 = vadd.f32 %v537_v10, %v302_v11 }
  0xf3   : > { %v565_v13 = vpop.f32.mrf.mxu0 }
  0xf4   : > { %v309_v14 = vsel %vm308_vm2, %v303_v12, 0.0  ;;  %v314_v15 = vmul.f32 %v303_v12, %v303_v12 }
  0xf5   : > { %310 = vadd.xlane.f32.xlu0 %v309_v14  ;;  %v305_v16 = vpop.f32.mrf.mxu0 }
  0xf6   : > { %v315_v18 = vsel %vm308_vm2, %v314_v15, 0.0 }
  0xf7   : > { %v566_v17 = vpop.f32.mrf.mxu0 }
  0xf9   : > { %316 = vadd.xlane.f32.xlu0 %v315_v18 }
 0x17e   : > { %v311_v20 = vpop.xlane.xlu0 %310 }
 0x17f   : > { %v313_v21 = vmul.f32 0.0625, %v311_v20 }
 0x181   : > { %v319_v23 = vmul.f32 %v313_v21, %v313_v21  ;;  %v322_v28 = vsub.f32 %v303_v12, %v313_v21 }
 0x182   : > { %v317_v22 = vpop.xlane.xlu0 %316 }
 0x183   : > { %v318_v24 = vmul.f32 0.0625, %v317_v22 }
 0x185   : > { %v320_v25 = vsub.f32 %v318_v24, %v319_v23 }
 0x187   : > { %v321_v26 = vmax.f32 %v320_v25, 0.0 }
 0x189   : > { %v323_v27 = vadd.f32 1e-05, %v321_v26 }
 0x18b   : > { %630 = vrsqrt.f32 %v323_v27 }
 0x198   : > { %v631_v29 = vpop.eup %630 }
 0x199   : > { %v325_v31 = vmul.f32 %v631_v29, %v322_v28 }
 0x19b   : > { %v331_v33 = vmul.f32 %v541_v30, %v325_v31 }
 0x19d   : > { %v337_v34 = vadd.f32 %v542_v32, %v331_v33 }
 0x19f   : > { %v338_v38 = vrot.slane %v337_v34, 1  ;;  %v348_v39 = vmul.f32 %v543_v36, %v337_v34 }
 0x1a1   : > { %v354_v40 = vmul.f32 %v544_v37, %v338_v38 }
 0x1a3   : > { %v355_v41 = vadd.f32 %v354_v40, %v348_v39 }
 0x1a5   : > { %v356_v42 = vsel %vm342_vm3, %v337_v34, %v355_v41 }
 0x1a6   : > { %v357_v43 = vpack.c.bf16 %v356_v42, %v356_v42 }
 0x1a8   : > { %570 = vmatmul.mubr.msk.bf16.vlgmr.msra.gmra.mxu1 %vm308_vm2, %v357_v43 }
 0x268   : > { %v408_v45 = vpop.f32.mrf.mxu1 }
 0x269   : > { %v409_v46 = vadd.f32 %v545_v44, %v408_v45 }
 0x26a   : > { %v571_v47 = vpop.f32.mrf.mxu1 }
 0x26b   : > { %v414_v48 = vsel %vm264_vm1, %v409_v46, 0.0  ;;  %v419_v49 = vmul.f32 %v409_v46, %v409_v46 }
 0x26c   : > { %415 = vadd.xlane.f32.xlu1 %v414_v48  ;;  %v411_v50 = vpop.f32.mrf.mxu1 }
 0x26d   : > { %v420_v52 = vsel %vm264_vm1, %v419_v49, 0.0 }
 0x26e   : > { %v572_v51 = vpop.f32.mrf.mxu1 }
 0x270   : > { %421 = vadd.xlane.f32.xlu1 %v420_v52 }
 0x2f5   : > { %v416_v53 = vpop.xlane.xlu1 %415 }
 0x2f6   : > { %v418_v54 = vmul.f32 0.03125, %v416_v53 }
 0x2f8   : > { %v424_v56 = vmul.f32 %v418_v54, %v418_v54  ;;  %v427_v61 = vsub.f32 %v409_v46, %v418_v54 }
 0x2f9   : > { %v422_v55 = vpop.xlane.xlu1 %421 }
 0x2fa   : > { %v423_v57 = vmul.f32 0.03125, %v422_v55 }
 0x2fc   : > { %v425_v58 = vsub.f32 %v423_v57, %v424_v56 }
 0x2fe   : > { %v426_v59 = vmax.f32 %v425_v58, 0.0 }
 0x300   : > { %v428_v60 = vadd.f32 1e-05, %v426_v59 }
 0x302   : > { %632 = vrsqrt.f32 %v428_v60 }
 0x30f   : > { %v633_v62 = vpop.eup %632 }
 0x310   : > { %v430_v0 = vmul.f32 %v633_v62, %v427_v61 }
 0x312   : > { %v436_v2 = vmul.f32 %v548_v63, %v430_v0 }
 0x314   : > { %v442_v3 = vadd.f32 %v549_v1, %v436_v2 }
 0x316   : > { %443 = vst.msk [vmem:[%s230_s9] sm:$0xff] %vm264_vm1, %v442_v3 }
 0x317   : > { %673 = shalt.err (!%p670_p0)
}
 0x318   : > { %s674_s25 = scalar_lea.hbm %s456_s13, 128  ;;  %s678_s30 = scalar_lea.hbm %s909_s5, 256 }
 0x319   : > { %p675_p1 = scmp.ne.s32.totalorder %s456_s13, %s674_s25  ;;  %p679_p4 = scmp.lt.s32.totalorder %s456_s13, %s909_s5 }
 0x31a   : > { %p680_p7 = scmp.lt.s32.totalorder %s678_s30, %s674_s25 }
 0x31b   : > { %p676_p2 = pnand %p675_p1, %p800_p5 }
 0x31c   : > { %p681_p8 = por %p680_p7, %p679_p4 }
 0x31d   : > { %p677_p3 = pneg %p676_p2 }
 0x31f   : > { %p682_p6 = pnand %p681_p8, %p677_p3 }
 0x321   : > { %685 = shalt.err (!%p682_p6)
}
 0x322   : > { %577 = dma.vmem_to_hbm [thread:$0]  (%p800_p5), %s459_s10, 128, %s456_s13, %s445_s14  }
 0x323 PF: > { %p589_p9 = scmp.ge.s32.totalorder %s724_s21, 2  ;;  %s470_s8 = sand.u32 1, %s712_s18  }
 0x324   : > { %p913_p10 = scmp.ne.s32.totalorder %s911_s29, 0  ;;  %s471_s9 = scalar_lea.sflag [#allocation4], %s470_s8 }
 0x326   : > { %p584_p11 = pnand %p589_p9, %p913_p10 }
 0x328   : > { %p585_p12 = pneg %p584_p11 }
 0x32a   : > { %707 = dma.done.wait (%p585_p12), %s471_s9, 128  }
 0x32b   : > { %709 = vsyncadd (%p585_p12), %s471_s9, 4294967168  ;;  %p16_p13 = scmp.ge.s32.totalorder %s787_s24, 4   ;;  %s914_s18 = smov %s716_s19 }
 0x32c   : > { %s915_s19 = smov %s720_s20  ;;  %s916_s20 = smov %s798_s27 }
 0x32d   : > { %s917_s21 = smov %s787_s24  ;;  %18 = sbr.rel (!%p16_p13) target bundleno = 4 (0x4), region = 80 }
 0x332   :  { %476 = vsyncpa [#allocation3], 1 }
 0x333   :  { %478 = vsyncpa [#allocation3 + $0x1], 1 }
 0x334   :  { %479 = vsyncpa [#allocation4], 1 }
 0x335   :  { %481 = vsyncpa [#allocation4 + $0x1], 1 }

// kernel: _cam_forward_jit.1
= control target key start
LH: loop header
LB: loop body
LE: loop exit
PB: predicated region body
PF: predicated region fallthrough
CT: control target
= control target key end

     0   :  { %10 = vsyncpa [#allocation3], 0  ;;  %s904_s0 = inlined_call_operand.vmem [shape: f32[2,8,32], index: 0, kind: input, shape index: {}]   ;;  %s905_s1 = inlined_call_operand.vmem [shape: bf16[32,16], index: 1, kind: input, shape index: {}]   ;;  %s906_s2 = inlined_call_operand.vmem [shape: f32[5,16], index: 2, kind: input, shape index: {}]   ;;  %s907_s3 = inlined_call_operand.hbm [shape: bf16[16,32], index: 3, kind: input, shape index: {}]   ;;  %s908_s4 = inlined_call_operand.vmem [shape: f32[3,32], index: 4, kind: input, shape index: {}]   ;;  %s909_s5 = inlined_call_operand.hbm [shape: f32[2,8,32], index: 5, kind: output, shape index: {}]  }
   0x1   :  { %11 = vsyncpa [#allocation4], 0 }
   0x2   :  { %13 = vsyncpa [#allocation4 + $0x1], 0  ;;  %s762_s18 = smov 0   ;;  %s764_s19 = smov 0  }
   0x3   :  { %s766_s20 = smov 0   ;;  %s768_s21 = smov 0  }
   0x4 LB: > { %s783_s22 = sadd.s32 4294967295, %s724_s21   ;;  %s529_s23 = sadd.s32 4294967294, %s724_s21   ;;  %s724_s21 = sphi %s768_s21, %s917_s21   ;;  %s720_s20 = sphi %s766_s20, %s916_s20   ;;  %s716_s19 = sphi %s764_s19, %s915_s19   ;;  %s712_s18 = sphi %s762_s18, %s914_s18  }
   0x5   : > { %s787_s24 = sadd.s32 1, %s724_s21   ;;  %s136_s25 = sadd.s32 1, %s720_s20 }
   0x6   : > { %s133_s26 = ssub.s32 %s724_s21, %s787_s24  ;;  %p146_p0 = scmp.ne.s32.totalorder %s720_s20, %s716_s19 }
   0x7   : > { %p134_p1 = scmp.eq.s32.totalorder %s133_s26, 0  ;;  %p147_p2 = scmp.eq.s32.totalorder %s783_s22, 1 }
   0x8   : > { %p152_p3 = scmp.ne.s32.totalorder %s716_s19, %s712_s18  ;;  %p153_p4 = scmp.eq.s32.totalorder %s529_s23, 1 }
   0x9   : > { %s798_s27 = scalar_select %p134_p1, %s720_s20, %s136_s25  }
   0xa   : > { %p800_p5 = por %p147_p2, %p146_p0  ;;  %p804_p6 = por %p153_p4, %p152_p3 }
   0xb   : > { %p530_p7 = scmp.ge.s32.totalorder %s724_s21, 1  ;;  %p160_p8 = scmp.lt.s32.totalorder %s724_s21, 3 }
   0xc   : > { %s911_s29 = scalar_select %p804_p6, 1, 0 }
   0xd   : > { %p587_p9 = scmp.eq.s32.totalorder %s783_s22, 0  ;;  %p811_p10 = pnand %p530_p7, %p160_p8 }
   0xe   : > { %s726_s6 = smov [#allocation2]  }
   0xf   : > { %s178_s7 = sshll.u32 %s726_s6, 4  ;;  %p579_p11 = pneg %p811_p10  ;;  %s179_s7 = int_to_ptr.vmem [resolvable:$true] %s178_s7 }
  0x10   : > { %s645_s8 = scalar_lea.vmem %s179_s7, 128  ;;  %p653_p3 = scmp.lt.s32.totalorder %s179_s7, %s179_s7 }
  0x11   : > { %p580_p12 = pnand %p587_p9, %p579_p11  ;;  %p646_p0 = scmp.ne.s32.totalorder %s179_s7, %s645_s8 }
  0x12   : > { %p654_p4 = scmp.lt.s32.totalorder %s645_s8, %s645_s8 }
  0x13   : > { %p636_p13 = pneg %p580_p12 }
  0x14   : > { %p655_p6 = por %p654_p4, %p653_p3 }
  0x15   : > { %p648_p1 = pnand %p646_p0, %p636_p13 }
  0x17   : > { %p649_p2 = pneg %p648_p1 }
  0x19   : > { %p656_p7 = pnand %p655_p6, %p649_p2 }
  0x1b   : > { %659 = shalt.err (!%p656_p7)
}
  0x1c   : > { %s727_s9 = smov 64   ;;  %s728_s10 = smov 4  }
  0x1d   : > { %582 = dma.hbm_to_vmem [thread:$0]  (!%p580_p12), %s907_s3, 128, %s179_s7, [#allocation3], %s727_s9, %s727_s9, %s728_s10  }
  0x1e   : > { %204 = sbr.rel (%p811_p10) target bundleno = 803 (0x323), region = 40 }
  0x23   : > { %703 = dma.done.wait (%p587_p9), [#allocation3], 128  }
  0x24   : > { %705 = vsyncadd (%p587_p9), [#allocation3], 4294967168  ;;  %p231_p8 = scmp.lt.s32.totalorder %s783_s22, 1  ;;  %v237_v0 = vlaneseq  ;;  %v729_v1 = vmov 0.0   ;;  %vm730_vm0 = vmmov 0   ;;  %v627_v4 = vld [vmem:[%s905_s1 + $0x8] sm:$0xff]  }
  0x25   : > { %559 = vmatprep.subr.bf16.mxu0 %v729_v1  ;;  %563 = vmatprep.mubr.msk.bf16.mxu0 %vm730_vm0, %v729_v1  ;;  %v628_v5 = vld [vmem:[%s905_s1] sm:$0xff]   ;;  %vm264_vm1 = vcmask 261120   ;;  %vm308_vm2 = vcmask 130048   ;;  %s228_s23 = sand.u32 1, %s716_s19   ;;  %s551_s8 = sshll.u32 %s783_s22, 7 }
  0x26   : > { %s232_s13 = scalar_select %p231_p8, %s783_s22, 1  ;;  %v238_v2 = vshrl.u32 %v237_v0, 7  ;;  %567 = vmatprep.subr.bf16.mxu1 %v729_v1  ;;  %569 = vmatprep.mubr.msk.bf16.mxu1 %vm730_vm0, %v729_v1  ;;  %v537_v10 = vld [vmem:[%s906_s2] ss:$0 sm:$0xff]  ;;  %v541_v30 = vld [vmem:[%s906_s2 + $0x1] ss:$0 sm:$0xff] }
  0x27   : > { %560 = vmatpush3.bf16.msra.mxu0 %v627_v4  ;;  %v629_v19 = vld [vmem:[#allocation2] sm:$0xff]   ;;  %s535_s25 = sshll.u32 %s228_s23, 3  ;;  %s731_s16 = smov [#allocation5]  }
  0x28   : > { %s536_s14 = sshll.u32 %s232_s13, 3  ;;  %v239_v3 = vsub.s32 0, %v238_v2  ;;  %561 = vmatprep.subr.bf16.mxu0 %v729_v1  ;;  %568 = vmatpush3.bf16.msra.mxu1 %v629_v19  ;;  %v542_v32 = vld [vmem:[%s906_s2 + $0x2] ss:$0 sm:$0xff]  ;;  %v341_v35 = vand.u32 7, %v238_v2  ;;  %s230_s9 = scalar_lea.vmem [#allocation5], %s535_s25 }
  0x29   : > { %s234_s17 = scalar_lea.vmem %s904_s0, %s536_s14  ;;  %v543_v36 = vld [vmem:[%s906_s2 + $0x4] ss:$0 sm:$0xff]  ;;  %v544_v37 = vld [vmem:[%s906_s2 + $0x3] ss:$0 sm:$0xff]  ;;  %v545_v44 = vld [vmem:[%s908_s4] ss:$0 sm:$0xff]  ;;  %s456_s13 = scalar_lea.hbm %s909_s5, %s551_s8 }
  0x2a   : > { %v236_v6 = vld [vmem:[%s234_s17] sm:$0xff]  ;;  %vm342_vm3 = vcmp.eq.s32.totalorder %v341_v35, 7  ;;  %s458_s10 = sshll.u32 %s230_s9, 4  ;;  %s445_s14 = scalar_lea.sflag [#allocation4], %s228_s23  ;;  %s459_s10 = int_to_ptr.vmem [resolvable:$true] %s458_s10 }
  0x2b   : > { %v240_v7 = vrot.slane %v236_v6, %v239_v3  ;;  %562 = vmatpush3.bf16.msra.mxu0 %v628_v5  ;;  %v548_v63 = vld [vmem:[%s908_s4 + $0x1] ss:$0 sm:$0xff]  ;;  %v549_v1 = vld [vmem:[%s908_s4 + $0x2] ss:$0 sm:$0xff]  ;;  %s660_s15 = scalar_lea.vmem %s459_s10, 128  ;;  %s664_s17 = sshll.u32 %s731_s16, 4  ;;  %s665_s17 = int_to_ptr.vmem [resolvable:$false] %s664_s17 }
  0x2c   : > { %p661_p6 = scmp.ne.s32.totalorder %s459_s10, %s660_s15  ;;  %s666_s22 = scalar_lea.vmem %s665_s17, 256 }
  0x2d   : > { %v241_v8 = vsub.f32 %v236_v6, %v240_v7  ;;  %p667_p11 = scmp.lt.s32.totalorder %s459_s10, %s665_s17  ;;  %p668_p12 = scmp.lt.s32.totalorder %s666_s22, %s660_s15 }
  0x2e   : > { %p662_p9 = pnand %p661_p6, %p800_p5 }
  0x2f   : > { %v242_v9 = vpack.c.bf16 %v241_v8, %v241_v8  ;;  %p669_p13 = por %p668_p12, %p667_p11 }
  0x30   : > { %p663_p10 = pneg %p662_p9 }
  0x31   : > { %564 = vmatmul.mubr.msk.bf16.vlgmr.msra.gmra.mxu0 %vm264_vm1, %v242_v9 }
  0x32   : > { %p670_p0 = pnand %p669_p13, %p663_p10 }
  0xf1   : > { %v302_v11 = vpop.f32.mrf.mxu0 }
  0xf2   : > { %v303_v12 = vadd.f32 %v537_v10, %v302_v11 }
  0xf3   : > { %v565_v13 = vpop.f32.mrf.mxu0 }
  0xf4   : > { %v309_v14 = vsel %vm308_vm2, %v303_v12, 0.0  ;;  %v314_v15 = vmul.f32 %v303_v12, %v303_v12 }
  0xf5   : > { %310 = vadd.xlane.f32.xlu0 %v309_v14  ;;  %v305_v16 = vpop.f32.mrf.mxu0 }
  0xf6   : > { %v315_v18 = vsel %vm308_vm2, %v314_v15, 0.0 }
  0xf7   : > { %v566_v17 = vpop.f32.mrf.mxu0 }
  0xf9   : > { %316 = vadd.xlane.f32.xlu0 %v315_v18 }
 0x17e   : > { %v311_v20 = vpop.xlane.xlu0 %310 }
 0x17f   : > { %v313_v21 = vmul.f32 0.0625, %v311_v20 }
 0x181   : > { %v319_v23 = vmul.f32 %v313_v21, %v313_v21  ;;  %v322_v28 = vsub.f32 %v303_v12, %v313_v21 }
 0x182   : > { %v317_v22 = vpop.xlane.xlu0 %316 }
 0x183   : > { %v318_v24 = vmul.f32 0.0625, %v317_v22 }
 0x185   : > { %v320_v25 = vsub.f32 %v318_v24, %v319_v23 }
 0x187   : > { %v321_v26 = vmax.f32 %v320_v25, 0.0 }
 0x189   : > { %v323_v27 = vadd.f32 1e-05, %v321_v26 }
 0x18b   : > { %630 = vrsqrt.f32 %v323_v27 }
 0x198   : > { %v631_v29 = vpop.eup %630 }
 0x199   : > { %v325_v31 = vmul.f32 %v631_v29, %v322_v28 }
 0x19b   : > { %v331_v33 = vmul.f32 %v541_v30, %v325_v31 }
 0x19d   : > { %v337_v34 = vadd.f32 %v542_v32, %v331_v33 }
 0x19f   : > { %v338_v38 = vrot.slane %v337_v34, 1  ;;  %v348_v39 = vmul.f32 %v543_v36, %v337_v34 }
 0x1a1   : > { %v354_v40 = vmul.f32 %v544_v37, %v338_v38 }
 0x1a3   : > { %v355_v41 = vadd.f32 %v354_v40, %v348_v39 }
 0x1a5   : > { %v356_v42 = vsel %vm342_vm3, %v337_v34, %v355_v41 }
 0x1a6   : > { %v357_v43 = vpack.c.bf16 %v356_v42, %v356_v42 }
 0x1a8   : > { %570 = vmatmul.mubr.msk.bf16.vlgmr.msra.gmra.mxu1 %vm308_vm2, %v357_v43 }
 0x268   : > { %v408_v45 = vpop.f32.mrf.mxu1 }
 0x269   : > { %v409_v46 = vadd.f32 %v545_v44, %v408_v45 }
 0x26a   : > { %v571_v47 = vpop.f32.mrf.mxu1 }
 0x26b   : > { %v414_v48 = vsel %vm264_vm1, %v409_v46, 0.0  ;;  %v419_v49 = vmul.f32 %v409_v46, %v409_v46 }
 0x26c   : > { %415 = vadd.xlane.f32.xlu1 %v414_v48  ;;  %v411_v50 = vpop.f32.mrf.mxu1 }
 0x26d   : > { %v420_v52 = vsel %vm264_vm1, %v419_v49, 0.0 }
 0x26e   : > { %v572_v51 = vpop.f32.mrf.mxu1 }
 0x270   : > { %421 = vadd.xlane.f32.xlu1 %v420_v52 }
 0x2f5   : > { %v416_v53 = vpop.xlane.xlu1 %415 }
 0x2f6   : > { %v418_v54 = vmul.f32 0.03125, %v416_v53 }
 0x2f8   : > { %v424_v56 = vmul.f32 %v418_v54, %v418_v54  ;;  %v427_v61 = vsub.f32 %v409_v46, %v418_v54 }
 0x2f9   : > { %v422_v55 = vpop.xlane.xlu1 %421 }
 0x2fa   : > { %v423_v57 = vmul.f32 0.03125, %v422_v55 }
 0x2fc   : > { %v425_v58 = vsub.f32 %v423_v57, %v424_v56 }
 0x2fe   : > { %v426_v59 = vmax.f32 %v425_v58, 0.0 }
 0x300   : > { %v428_v60 = vadd.f32 1e-05, %v426_v59 }
 0x302   : > { %632 = vrsqrt.f32 %v428_v60 }
 0x30f   : > { %v633_v62 = vpop.eup %632 }
 0x310   : > { %v430_v0 = vmul.f32 %v633_v62, %v427_v61 }
 0x312   : > { %v436_v2 = vmul.f32 %v548_v63, %v430_v0 }
 0x314   : > { %v442_v3 = vadd.f32 %v549_v1, %v436_v2 }
 0x316   : > { %443 = vst.msk [vmem:[%s230_s9] sm:$0xff] %vm264_vm1, %v442_v3 }
 0x317   : > { %673 = shalt.err (!%p670_p0)
}
 0x318   : > { %s674_s25 = scalar_lea.hbm %s456_s13, 128  ;;  %s678_s30 = scalar_lea.hbm %s909_s5, 256 }
 0x319   : > { %p675_p1 = scmp.ne.s32.totalorder %s456_s13, %s674_s25  ;;  %p679_p4 = scmp.lt.s32.totalorder %s456_s13, %s909_s5 }
 0x31a   : > { %p680_p7 = scmp.lt.s32.totalorder %s678_s30, %s674_s25 }
 0x31b   : > { %p676_p2 = pnand %p675_p1, %p800_p5 }
 0x31c   : > { %p681_p8 = por %p680_p7, %p679_p4 }
 0x31d   : > { %p677_p3 = pneg %p676_p2 }
 0x31f   : > { %p682_p6 = pnand %p681_p8, %p677_p3 }
 0x321   : > { %685 = shalt.err (!%p682_p6)
}
 0x322   : > { %577 = dma.vmem_to_hbm [thread:$0]  (%p800_p5), %s459_s10, 128, %s456_s13, %s445_s14  }
 0x323 PF: > { %p589_p9 = scmp.ge.s32.totalorder %s724_s21, 2  ;;  %s470_s8 = sand.u32 1, %s712_s18  }
 0x324   : > { %p913_p10 = scmp.ne.s32.totalorder %s911_s29, 0  ;;  %s471_s9 = scalar_lea.sflag [#allocation4], %s470_s8 }
 0x326   : > { %p584_p11 = pnand %p589_p9, %p913_p10 }
 0x328   : > { %p585_p12 = pneg %p584_p11 }
 0x32a   : > { %707 = dma.done.wait (%p585_p12), %s471_s9, 128  }
 0x32b   : > { %709 = vsyncadd (%p585_p12), %s471_s9, 4294967168  ;;  %p16_p13 = scmp.ge.s32.totalorder %s787_s24, 4   ;;  %s914_s18 = smov %s716_s19 }
 0x32c   : > { %s915_s19 = smov %s720_s20  ;;  %s916_s20 = smov %s798_s27 }
 0x32d   : > { %s917_s21 = smov %s787_s24  ;;  %18 = sbr.rel (!%p16_p13) target bundleno = 4 (0x4), region = 80 }
 0x332   :  { %476 = vsyncpa [#allocation3], 1 }
 0x333   :  { %478 = vsyncpa [#allocation3 + $0x1], 1 }
 0x334   :  { %479 = vsyncpa [#allocation4], 1 }
 0x335   :  { %481 = vsyncpa [#allocation4 + $0x1], 1 }

</bundles_post_ra>
